<compile_context>
chip_gen: v5e
topology: v5e:2x2
jax: 0.10.0
libtpu: 0.0.40
codegen_flags: <defaults>
</compile_context>

<pallas_src>
import functools

import jax
import jax.numpy as jnp
from jax.experimental import pallas as pl
from jax.experimental.pallas import tpu as pltpu


# -----------------------------------------------------------------------------
# Kernels
# -----------------------------------------------------------------------------
def _mlp2_kernel(x_ref, w1_ref, b1_ref, w2_ref, b2_ref, o_ref):
    # ReLU(ReLU(x @ W1 + b1) @ W2 + b2), all within one VMEM row tile.
    x = x_ref[...].astype(w1_ref.dtype)
    h = jnp.dot(x, w1_ref[...], preferred_element_type=jnp.float32)
    h = jnp.maximum(h + b1_ref[...].astype(jnp.float32), 0.0)
    y = jnp.dot(h.astype(w2_ref.dtype), w2_ref[...],
                preferred_element_type=jnp.float32)
    o_ref[...] = jnp.maximum(y + b2_ref[...].astype(jnp.float32),
                             0.0).astype(o_ref.dtype)


def _gcn_ln_jump_kernel(a_ref, f_ref, res_ref, g_ref, b_ref,
                        tilde_ref, wa_ref, wb_ref, bj_ref,
                        ln_ref, jump_ref, acc_ref, *,
                        transpose_a, k_total, tk):
    # K-tiled (A @ F) accumulation, then on the last K step a fused epilogue:
    #   LN(acc + residual)  and  sigmoid(LN @ Wa + tilde @ Wb + bj).
    k = pl.program_id(1)

    @pl.when(k == 0)
    def _():
        acc_ref[...] = jnp.zeros_like(acc_ref)

    a = a_ref[...]
    f = f_ref[...]
    if k_total % tk != 0:
        # Ragged K boundary: zero the out-of-range contraction slots in BOTH
        # operands so padded tail data cannot pollute the accumulator.
        base = k * tk
        f_ids = jax.lax.broadcasted_iota(jnp.int32, f.shape, 0) + base
        f = jnp.where(f_ids < k_total, f, jnp.zeros_like(f))
        a_axis = 0 if transpose_a else 1
        a_ids = jax.lax.broadcasted_iota(jnp.int32, a.shape, a_axis) + base
        a = jnp.where(a_ids < k_total, a, jnp.zeros_like(a))

    if transpose_a:
        # A block is (tk, tm): contract dim 0 against dim 0 of F -> (tm, d).
        part = jax.lax.dot_general(a, f, (((0,), (0,)), ((), ())),
                                   preferred_element_type=jnp.float32)
    else:
        part = jnp.dot(a, f, preferred_element_type=jnp.float32)
    acc_ref[...] += part

    @pl.when(k == pl.num_programs(1) - 1)
    def _():
        gc = acc_ref[...] + res_ref[...].astype(jnp.float32)
        mean = jnp.mean(gc, axis=-1, keepdims=True)
        cent = gc - mean
        var = jnp.mean(cent * cent, axis=-1, keepdims=True)
        normed = cent * jax.lax.rsqrt(var + 1e-5)  # torch LayerNorm default eps
        ln = normed * g_ref[...].astype(jnp.float32) + b_ref[...].astype(jnp.float32)
        ln_ref[...] = ln.astype(ln_ref.dtype)
        # Jump network: concat([ln, tilde], 1) @ W + b  ==  ln @ Wa + tilde @ Wb + b
        y = jnp.dot(ln.astype(wa_ref.dtype), wa_ref[...],
                    preferred_element_type=jnp.float32)
        y = y + jnp.dot(tilde_ref[...].astype(wb_ref.dtype), wb_ref[...],
                        preferred_element_type=jnp.float32)
        y = y + bj_ref[...].astype(jnp.float32)
        jump_ref[...] = (1.0 / (1.0 + jnp.exp(-y))).astype(jump_ref.dtype)


# -----------------------------------------------------------------------------
# Wrappers
# -----------------------------------------------------------------------------
def _fit_tile(extent, want, align):
    """Full extent (full-dim exemption) or a tile rounded to `align`."""
    if extent <= want:
        return extent
    return max((want // align) * align, align)


def mlp2_forward(x, w1, b1, w2, b2, *, tile_m=1024, out_dtype=None,
                 vmem_limit_bytes=None):
    m, d_in = x.shape
    d_h = w1.shape[1]
    d_out = w2.shape[1]
    out_dtype = out_dtype or x.dtype
    tm = _fit_tile(m, tile_m, 8)
    return pl.pallas_call(
        _mlp2_kernel,
        out_shape=jax.ShapeDtypeStruct((m, d_out), out_dtype),
        grid_spec=pltpu.PrefetchScalarGridSpec(
            num_scalar_prefetch=0,
            grid=(pl.cdiv(m, tm),),
            in_specs=[
                pl.BlockSpec((tm, d_in), lambda i: (i, 0)),
                pl.BlockSpec((d_in, d_h), lambda i: (0, 0)),
                pl.BlockSpec((1, d_h), lambda i: (0, 0)),
                pl.BlockSpec((d_h, d_out), lambda i: (0, 0)),
                pl.BlockSpec((1, d_out), lambda i: (0, 0)),
            ],
            out_specs=pl.BlockSpec((tm, d_out), lambda i: (i, 0)),
        ),
        compiler_params=pltpu.CompilerParams(
            dimension_semantics=("parallel",),
            vmem_limit_bytes=vmem_limit_bytes),
    )(x, w1, b1.reshape(1, d_h), w2, b2.reshape(1, d_out))


def gcn_ln_jump_forward(a_dense, fea, residual, gamma, beta,
                        tilde, w_a, w_b, bias_j, *,
                        transpose_a=False, tile_m=256, tile_k=2048,
                        vmem_limit_bytes=None):
    """LayerNorm(A(^T) @ fea + residual) and sigmoid(LN @ Wa + tilde @ Wb + b).

    A is always read from `a_dense` in its stored orientation; transpose_a=True
    reads it through a transposed BlockSpec (no A^T materialized in HBM).
    """
    if transpose_a:
        k_total, m = a_dense.shape
        tm = _fit_tile(m, tile_m, 128)       # A block last dim
        tk = _fit_tile(k_total, tile_k, 8)   # A block sublane dim / F rows
        a_spec = pl.BlockSpec((tk, tm), lambda i, k: (k, i))
    else:
        m, k_total = a_dense.shape
        tm = _fit_tile(m, tile_m, 8)
        tk = _fit_tile(k_total, tile_k, 128)
        a_spec = pl.BlockSpec((tm, tk), lambda i, k: (i, k))
    d = fea.shape[1]

    kernel = functools.partial(_gcn_ln_jump_kernel,
                               transpose_a=transpose_a,
                               k_total=k_total, tk=tk)

    return pl.pallas_call(
        kernel,
        out_shape=(jax.ShapeDtypeStruct((m, d), residual.dtype),
                   jax.ShapeDtypeStruct((m, d), residual.dtype)),
        grid_spec=pltpu.PrefetchScalarGridSpec(
            num_scalar_prefetch=0,
            grid=(pl.cdiv(m, tm), pl.cdiv(k_total, tk)),
            in_specs=[
                a_spec,
                pl.BlockSpec((tk, d), lambda i, k: (k, 0)),
                pl.BlockSpec((tm, d), lambda i, k: (i, 0)),
                pl.BlockSpec((1, d), lambda i, k: (0, 0)),
                pl.BlockSpec((1, d), lambda i, k: (0, 0)),
                pl.BlockSpec((tm, d), lambda i, k: (i, 0)),
                pl.BlockSpec((d, d), lambda i, k: (0, 0)),
                pl.BlockSpec((d, d), lambda i, k: (0, 0)),
                pl.BlockSpec((1, d), lambda i, k: (0, 0)),
            ],
            out_specs=[pl.BlockSpec((tm, d), lambda i, k: (i, 0)),
                       pl.BlockSpec((tm, d), lambda i, k: (i, 0))],
            scratch_shapes=[pltpu.VMEM((tm, d), jnp.float32)]),
        compiler_params=pltpu.CompilerParams(
            dimension_semantics=("parallel", "arbitrary"),
            vmem_limit_bytes=vmem_limit_bytes),
    )(a_dense, fea, residual, gamma.reshape(1, d), beta.reshape(1, d),
      tilde, w_a, w_b, bias_j.reshape(1, d))


def gcn_mlp_forward(params, z, z_tilde, edge_indices, edge_attrs, *,
                    compute_dtype=None, vmem_limit_bytes=None):
    """Full GCNMLPModule.forward. Returns (next_z, next_z_tilde).

    compute_dtype=jnp.bfloat16 puts all matmul operands (A, features, weights)
    on the native bf16 MXU path; accumulation and LN/sigmoid epilogues stay f32.
    """
    cons, vars_ = z
    tilde_cons, tilde_vars = z_tilde
    n_cons, n_vars = cons.shape[0], vars_.shape[0]
    cdt = compute_dtype or cons.dtype
    cast = lambda a: a if a.dtype == cdt else a.astype(cdt)

    # TODO(synk): torch.sparse_coo_tensor SpMM has no clean Pallas equivalent at
    # this scale; A is densified via an XLA scatter-add (duplicate edges summed,
    # matching COO coalescing) and consumed K-tiled inside the fused kernel.
    vals = edge_attrs.reshape(-1).astype(cdt)
    a_dense = jnp.zeros((n_cons, n_vars), cdt).at[
        edge_indices[0], edge_indices[1]].add(vals)

    mlp_cons = mlp2_forward(cons, cast(params["wc1"]), params["bc1"],
                            cast(params["wc2"]), params["bc2"],
                            out_dtype=cdt, vmem_limit_bytes=vmem_limit_bytes)
    mlp_vars = mlp2_forward(vars_, cast(params["wv1"]), params["bv1"],
                            cast(params["wv2"]), params["bv2"],
                            out_dtype=cdt, vmem_limit_bytes=vmem_limit_bytes)

    # cons branch: A @ mlp_vars ; vars branch: A^T @ mlp_cons (transposed read).
    ln_cons, jump_cons = gcn_ln_jump_forward(
        a_dense, mlp_vars, cons, params["ln_c_g"], params["ln_c_b"],
        cast(tilde_cons), cast(params["wjc_a"]), cast(params["wjc_b"]),
        params["bjc"], transpose_a=False, vmem_limit_bytes=vmem_limit_bytes)
    ln_vars, jump_vars = gcn_ln_jump_forward(
        a_dense, mlp_cons, vars_, params["ln_v_g"], params["ln_v_b"],
        cast(tilde_vars), cast(params["wjv_a"]), cast(params["wjv_b"]),
        params["bjv"], transpose_a=True, vmem_limit_bytes=vmem_limit_bytes)

    return (ln_cons, ln_vars), (jump_cons, jump_vars)


# -----------------------------------------------------------------------------
# Demo / self-check
# -----------------------------------------------------------------------------
if __name__ == "__main__":
    key = jax.random.PRNGKey(0)
    ks = jax.random.split(key, 26)

    n_cons, n_vars, d, n_edges = 48, 80, 64, 256
    f32 = jnp.float32

    cons = jax.random.normal(ks[0], (n_cons, d), f32) * 0.5
    vars_ = jax.random.normal(ks[1], (n_vars, d), f32) * 0.5
    tilde_cons = jax.random.normal(ks[2], (n_cons, d), f32) * 0.5
    tilde_vars = jax.random.normal(ks[3], (n_vars, d), f32) * 0.5

    rows = jax.random.randint(ks[4], (n_edges,), 0, n_cons)
    cols = jax.random.randint(ks[5], (n_edges,), 0, n_vars)
    edge_indices = jnp.stack([rows, cols])
    edge_attrs = jax.random.normal(ks[6], (n_edges, 1), f32) * 0.1

    def lin_w(k, din, dout):
        return jax.random.normal(k, (din, dout), f32) * (1.0 / jnp.sqrt(din))

    params = dict(
        wc1=lin_w(ks[7], d, d), bc1=jax.random.normal(ks[8], (d,), f32) * 0.1,
        wc2=lin_w(ks[9], d, d), bc2=jax.random.normal(ks[10], (d,), f32) * 0.1,
        wv1=lin_w(ks[11], d, d), bv1=jax.random.normal(ks[12], (d,), f32) * 0.1,
        wv2=lin_w(ks[13], d, d), bv2=jax.random.normal(ks[14], (d,), f32) * 0.1,
        ln_c_g=1.0 + 0.1 * jax.random.normal(ks[15], (d,), f32),
        ln_c_b=0.1 * jax.random.normal(ks[16], (d,), f32),
        ln_v_g=1.0 + 0.1 * jax.random.normal(ks[17], (d,), f32),
        ln_v_b=0.1 * jax.random.normal(ks[18], (d,), f32),
        wjc_a=lin_w(ks[19], d, d), wjc_b=lin_w(ks[20], d, d),
        bjc=jax.random.normal(ks[21], (d,), f32) * 0.1,
        wjv_a=lin_w(ks[22], d, d), wjv_b=lin_w(ks[23], d, d),
        bjv=jax.random.normal(ks[24], (d,), f32) * 0.1,
    )

    # f32 path (matches PyTorch numerics).
    (out_ln_cons, out_ln_vars), (out_j_cons, out_j_vars) = jax.block_until_ready(
        gcn_mlp_forward(params, (cons, vars_), (tilde_cons, tilde_vars),
                        edge_indices, edge_attrs))

    # ------------------------- pure-JAX reference -------------------------
    HI = jax.lax.Precision.HIGHEST
    dotH = lambda a, b: jnp.dot(a, b, precision=HI)
    relu = lambda x: jnp.maximum(x, 0.0)
    sig = lambda x: 1.0 / (1.0 + jnp.exp(-x))

    def ln_ref(x, g, b, eps=1e-5):
        mu = jnp.mean(x, -1, keepdims=True)
        var = jnp.mean((x - mu) ** 2, -1, keepdims=True)
        return (x - mu) / jnp.sqrt(var + eps) * g + b

    r_mlp_cons = relu(dotH(relu(dotH(cons, params["wc1"]) + params["bc1"]),
                           params["wc2"]) + params["bc2"])
    r_mlp_vars = relu(dotH(relu(dotH(vars_, params["wv1"]) + params["bv1"]),
                           params["wv2"]) + params["bv2"])
    a_ref = jnp.zeros((n_cons, n_vars), f32).at[rows, cols].add(
        edge_attrs.reshape(-1))
    r_ln_cons = ln_ref(dotH(a_ref, r_mlp_vars) + cons,
                       params["ln_c_g"], params["ln_c_b"])
    r_ln_vars = ln_ref(dotH(a_ref.T, r_mlp_cons) + vars_,
                       params["ln_v_g"], params["ln_v_b"])
    r_j_cons = sig(dotH(r_ln_cons, params["wjc_a"]) +
                   dotH(tilde_cons, params["wjc_b"]) + params["bjc"])
    r_j_vars = sig(dotH(r_ln_vars, params["wjv_a"]) +
                   dotH(tilde_vars, params["wjv_b"]) + params["bjv"])

    for got, ref, name in [(out_ln_cons, r_ln_cons, "ln_cons"),
                           (out_ln_vars, r_ln_vars, "ln_vars"),
                           (out_j_cons, r_j_cons, "jump_cons"),
                           (out_j_vars, r_j_vars, "jump_vars")]:
        assert got.shape == ref.shape, name
        assert jnp.allclose(got, ref, atol=1e-3, rtol=1e-3), f"mismatch: {name}"

    # bf16 MXU-path smoke test (review item): same kernels, bf16 matmul
    # operands, f32 accumulation/epilogues. Loose tolerance for bf16 rounding.
    (b_ln_cons, b_ln_vars), (b_j_cons, b_j_vars) = jax.block_until_ready(
        gcn_mlp_forward(params, (cons, vars_), (tilde_cons, tilde_vars),
                        edge_indices, edge_attrs, compute_dtype=jnp.bfloat16))
    for got, ref, name in [(b_ln_cons, r_ln_cons, "bf16 ln_cons"),
                           (b_ln_vars, r_ln_vars, "bf16 ln_vars"),
                           (b_j_cons, r_j_cons, "bf16 jump_cons"),
                           (b_j_vars, r_j_vars, "bf16 jump_vars")]:
        assert got.shape == ref.shape, name
        assert bool(jnp.all(jnp.isfinite(got))), f"non-finite: {name}"
        assert jnp.allclose(got, ref, atol=0.15, rtol=0.15), f"mismatch: {name}"

    print("KERNEL_OK")
</pallas_src>

<mosaic_0001>
module attributes {stable_mosaic.version = 11 : i64} {
  func.func @_mlp2_kernel(%arg0: i32, %arg1: memref<48x64xf32, #tpu.memory_space<vmem>>, %arg2: memref<64x64xf32, #tpu.memory_space<vmem>>, %arg3: memref<1x64xf32, #tpu.memory_space<vmem>>, %arg4: memref<64x64xf32, #tpu.memory_space<vmem>>, %arg5: memref<1x64xf32, #tpu.memory_space<vmem>>, %arg6: memref<48x64xf32, #tpu.memory_space<vmem>>) attributes {dimension_semantics = [#tpu.dimension_semantics<parallel>], iteration_bounds = array<i64: 1>, scalar_prefetch = 0 : i64, scratch_operands = 0 : i64, tpu.core_type = #tpu.core_type<tc>, window_params = [{transform_indices = @transform_0, window_bounds = array<i64: 48, 64>}, {pipeline_mode = #tpu.pipeline_mode<synchronous>, transform_indices = @transform_1, window_bounds = array<i64: 64, 64>}, {pipeline_mode = #tpu.pipeline_mode<synchronous>, transform_indices = @transform_2, window_bounds = array<i64: 1, 64>}, {pipeline_mode = #tpu.pipeline_mode<synchronous>, transform_indices = @transform_3, window_bounds = array<i64: 64, 64>}, {pipeline_mode = #tpu.pipeline_mode<synchronous>, transform_indices = @transform_4, window_bounds = array<i64: 1, 64>}, {transform_indices = @transform_5, window_bounds = array<i64: 48, 64>}]} {
    %c0 = arith.constant 0 : index
    %c0_0 = arith.constant 0 : index
    %0 = vector.load %arg1[%c0, %c0_0] : memref<48x64xf32, #tpu.memory_space<vmem>>, vector<48x64xf32>
    %c0_1 = arith.constant 0 : index
    %c0_2 = arith.constant 0 : index
    %1 = vector.load %arg2[%c0_1, %c0_2] : memref<64x64xf32, #tpu.memory_space<vmem>>, vector<64x64xf32>
    %cst = arith.constant dense<0.000000e+00> : vector<48x64xf32>
    %2 = tpu.matmul %0, %1, %cst {dimension_numbers = #tpu.dot_dimension_numbers<[1], [0], [0], [1], [0, 0, 1, 1], [], []>} : vector<48x64xf32>, vector<64x64xf32>, vector<48x64xf32> -> vector<48x64xf32>
    %c0_3 = arith.constant 0 : index
    %c0_4 = arith.constant 0 : index
    %3 = vector.load %arg3[%c0_3, %c0_4] : memref<1x64xf32, #tpu.memory_space<vmem>>, vector<1x64xf32>
    %4 = vector.broadcast %3 : vector<1x64xf32> to vector<48x64xf32>
    %5 = arith.addf %2, %4 : vector<48x64xf32>
    %cst_5 = arith.constant 0.000000e+00 : f32
    %6 = vector.broadcast %cst_5 : f32 to vector<48x64xf32>
    %7 = arith.maximumf %5, %6 : vector<48x64xf32>
    %c0_6 = arith.constant 0 : index
    %c0_7 = arith.constant 0 : index
    %8 = vector.load %arg4[%c0_6, %c0_7] : memref<64x64xf32, #tpu.memory_space<vmem>>, vector<64x64xf32>
    %cst_8 = arith.constant dense<0.000000e+00> : vector<48x64xf32>
    %9 = tpu.matmul %7, %8, %cst_8 {dimension_numbers = #tpu.dot_dimension_numbers<[1], [0], [0], [1], [0, 0, 1, 1], [], []>} : vector<48x64xf32>, vector<64x64xf32>, vector<48x64xf32> -> vector<48x64xf32>
    %c0_9 = arith.constant 0 : index
    %c0_10 = arith.constant 0 : index
    %10 = vector.load %arg5[%c0_9, %c0_10] : memref<1x64xf32, #tpu.memory_space<vmem>>, vector<1x64xf32>
    %11 = vector.broadcast %10 : vector<1x64xf32> to vector<48x64xf32>
    %12 = arith.addf %9, %11 : vector<48x64xf32>
    %cst_11 = arith.constant 0.000000e+00 : f32
    %13 = vector.broadcast %cst_11 : f32 to vector<48x64xf32>
    %14 = arith.maximumf %12, %13 : vector<48x64xf32>
    %c0_12 = arith.constant 0 : index
    %c0_13 = arith.constant 0 : index
    %15 = vector.load %arg6[%c0_12, %c0_13] : memref<48x64xf32, #tpu.memory_space<vmem>>, vector<48x64xf32>
    tpu.vector_store %arg6[%c0_12, %c0_13], %14 {strides = array<i32>} : memref<48x64xf32, #tpu.memory_space<vmem>>, vector<48x64xf32>,
    return
  }
  func.func @transform_0(%arg0: i32) -> (i32, i32) {
    %c0_i32 = arith.constant 0 : i32
    %c0_i32_0 = arith.constant 0 : i32
    return %arg0, %c0_i32 : i32, i32
  }
  func.func @transform_1(%arg0: i32) -> (i32, i32) {
    %c0_i32 = arith.constant 0 : i32
    %c0_i32_0 = arith.constant 0 : i32
    %c0_i32_1 = arith.constant 0 : i32
    return %c0_i32, %c0_i32_0 : i32, i32
  }
  func.func @transform_2(%arg0: i32) -> (i32, i32) {
    %c0_i32 = arith.constant 0 : i32
    %c0_i32_0 = arith.constant 0 : i32
    %c0_i32_1 = arith.constant 0 : i32
    return %c0_i32, %c0_i32_0 : i32, i32
  }
  func.func @transform_3(%arg0: i32) -> (i32, i32) {
    %c0_i32 = arith.constant 0 : i32
    %c0_i32_0 = arith.constant 0 : i32
    %c0_i32_1 = arith.constant 0 : i32
    return %c0_i32, %c0_i32_0 : i32, i32
  }
  func.func @transform_4(%arg0: i32) -> (i32, i32) {
    %c0_i32 = arith.constant 0 : i32
    %c0_i32_0 = arith.constant 0 : i32
    %c0_i32_1 = arith.constant 0 : i32
    return %c0_i32, %c0_i32_0 : i32, i32
  }
  func.func @transform_5(%arg0: i32) -> (i32, i32) {
    %c0_i32 = arith.constant 0 : i32
    %c0_i32_0 = arith.constant 0 : i32
    return %arg0, %c0_i32 : i32, i32
  }
}

</mosaic_0001>

<bundles_post_ra>
// kernel: tpu_custom_call.1
= control target key start
LH: loop header
LB: loop body
LE: loop exit
PB: predicated region body
PF: predicated region fallthrough
CT: control target
= control target key end

     0   :  { %10 = vsyncpa [#allocation3], 0  ;;  %s465_s0 = inlined_call_operand.hbm [shape: f32[48,64], index: 0, kind: input, shape index: {}]   ;;  %s466_s1 = inlined_call_operand.hbm [shape: f32[64,64], index: 1, kind: input, shape index: {}]   ;;  %s467_s2 = inlined_call_operand.vmem [shape: f32[1,64], index: 2, kind: input, shape index: {}]   ;;  %s468_s3 = inlined_call_operand.hbm [shape: f32[64,64], index: 3, kind: input, shape index: {}]   ;;  %s469_s4 = inlined_call_operand.vmem [shape: f32[1,64], index: 4, kind: input, shape index: {}]   ;;  %s470_s5 = inlined_call_operand.hbm [shape: f32[48,64], index: 5, kind: output, shape index: {}]  }
   0x1   :  { %11 = vsyncpa [#allocation6], 0 }
   0x2   :  { %12 = vsyncpa [#allocation4], 0  ;;  %s30_s20 = sshll.u32 %s466_s1, 4  ;;  %s381_s21 = smov [#allocation5]   ;;  %s31_s20 = int_to_ptr.hbm [resolvable:$true] %s30_s20 }
   0x3   :  { %s32_s22 = sshll.u32 %s381_s21, 4  ;;  %s17_s25 = sshll.u32 %s465_s0, 4  ;;  %s33_s22 = int_to_ptr.vmem [resolvable:$true] %s32_s22  ;;  %s18_s25 = int_to_ptr.hbm [resolvable:$true] %s17_s25 }
   0x4   :  { %s382_s26 = smov 128   ;;  %s383_s27 = smov 8  }
   0x5   :  { %38 = dma.hbm_to_vmem [thread:$0]  %s31_s20, 1024, %s33_s22, [#allocation6], %s382_s26, %s382_s26, %s383_s27  }
   0x6   :  { %s384_s28 = smov [#allocation2]   ;;  %s45_s1 = sshll.u32 %s468_s3, 4  ;;  %s46_s1 = int_to_ptr.hbm [resolvable:$true] %s45_s1 }
   0x7   :  { %s19_s29 = sshll.u32 %s384_s28, 4  ;;  %s385_s0 = smov [#allocation7]   ;;  %s20_s29 = int_to_ptr.vmem [resolvable:$true] %s19_s29 }
   0x8   :  { %25 = dma.hbm_to_vmem [thread:$0]  %s18_s25, 768, %s20_s29, [#allocation3], %s382_s26, %s382_s26, %s383_s27  }
   0x9   :  { %s47_s7 = sshll.u32 %s385_s0, 4  ;;  %s48_s7 = int_to_ptr.vmem [resolvable:$true] %s47_s7 }
   0xa   :  { %53 = dma.hbm_to_vmem [thread:$0]  %s46_s1, 1024, %s48_s7, [#allocation6], %s382_s26, %s382_s26, %s383_s27  }
   0xb   :  { %375 = dma.done.wait [#allocation3], 768  }
   0xc   :  { %376 = vsyncadd [#allocation3], 4294966528 }
   0xd   :  { %377 = dma.done.wait [#allocation6], 2048  }
   0xe   :  { %378 = vsyncadd [#allocation6], 4294965248  ;;  %v81_v0 = vld [vmem:[#allocation5 + $0x38] sm:$0xff]  ;;  %v80_v1 = vld [vmem:[#allocation5 + $0x30] sm:$0xff]  ;;  %vm86_vm0 = vcmask 523264   ;;  %s229_s13 = sshll.u32 %s470_s5, 4  ;;  %s230_s13 = int_to_ptr.hbm [resolvable:$true] %s229_s13 }
   0xf   :  { %255 = vmatpush.msra.mxu2 %v81_v0  ;;  %113 = vmatpush.msra.mxu0 %v81_v0  ;;  %v79_v2 = vld [vmem:[#allocation5 + $0x28] sm:$0xff]  ;;  %v78_v3 = vld [vmem:[#allocation5 + $0x20] sm:$0xff]  ;;  %v153_v4 = vld [vmem:[#allocation7 + $0x38] sm:$0xff] }
  0x10   :  { %v152_v5 = vld [vmem:[#allocation7 + $0x30] sm:$0xff]  ;;  %v77_v6 = vld [vmem:[#allocation5 + $0x18] sm:$0xff]  ;;  %263 = vmatpush.msra.mxu3 %v153_v4  ;;  %184 = vmatpush.msra.mxu1 %v153_v4  ;;  %v151_v7 = vld [vmem:[#allocation7 + $0x28] sm:$0xff] }
  0x11   :  { %256 = vmatpush.msra.mxu2 %v80_v1  ;;  %114 = vmatpush.msra.mxu0 %v80_v1  ;;  %v76_v8 = vld [vmem:[#allocation5 + $0x10] sm:$0xff]  ;;  %v150_v9 = vld [vmem:[#allocation7 + $0x20] sm:$0xff]  ;;  %v75_v10 = vld [vmem:[#allocation5 + $0x8] sm:$0xff] }
  0x12   :  { %264 = vmatpush.msra.mxu3 %v152_v5  ;;  %185 = vmatpush.msra.mxu1 %v152_v5  ;;  %v149_v11 = vld [vmem:[#allocation7 + $0x18] sm:$0xff]  ;;  %v74_v12 = vld [vmem:[#allocation5] sm:$0xff]  ;;  %v71_v13 = vld [vmem:[#allocation2 + $0x18] sm:$0xff] }
  0x13   :  { %257 = vmatpush.msra.mxu2 %v79_v2  ;;  %115 = vmatpush.msra.mxu0 %v79_v2  ;;  %v68_v14 = vld [vmem:[#allocation2] sm:$0xff]  ;;  %v69_v16 = vld [vmem:[#allocation2 + $0x8] sm:$0xff]  ;;  %v70_v18 = vld [vmem:[#allocation2 + $0x10] sm:$0xff] }
  0x14   :  { %265 = vmatpush.msra.mxu3 %v151_v7  ;;  %186 = vmatpush.msra.mxu1 %v151_v7  ;;  %v72_v15 = vld [vmem:[#allocation2 + $0x20] sm:$0xff]  ;;  %v73_v17 = vld [vmem:[#allocation2 + $0x28] sm:$0xff]  ;;  %v147_v20 = vld [vmem:[#allocation7 + $0x8] sm:$0xff] }
  0x15   :  { %258 = vmatpush.msra.mxu2 %v78_v3  ;;  %116 = vmatpush.msra.mxu0 %v78_v3  ;;  %v148_v19 = vld [vmem:[#allocation7 + $0x10] sm:$0xff]  ;;  %v146_v21 = vld [vmem:[#allocation7] sm:$0xff] }
  0x16   :  { %266 = vmatpush.msra.mxu3 %v150_v9  ;;  %187 = vmatpush.msra.mxu1 %v150_v9  ;;  %v277_v22 = vld [vmem:[%s467_s2] ss:$0 sm:$0xff] }
  0x17   :  { %259 = vmatpush.msra.mxu2 %v77_v6  ;;  %117 = vmatpush.msra.mxu0 %v77_v6  ;;  %v278_v41 = vld [vmem:[%s469_s4] ss:$0 sm:$0xff]  ;;  %s386_s4 = smov [#allocation8]  }
  0x18   :  { %267 = vmatpush.msra.mxu3 %v149_v11  ;;  %188 = vmatpush.msra.mxu1 %v149_v11  ;;  %s227_s10 = sshll.u32 %s386_s4, 4  ;;  %s228_s10 = int_to_ptr.vmem [resolvable:$true] %s227_s10 }
  0x19   :  { %260 = vmatpush.msra.mxu2 %v76_v8  ;;  %118 = vmatpush.msra.mxu0 %v76_v8 }
  0x1a   :  { %268 = vmatpush.msra.mxu3 %v148_v19  ;;  %189 = vmatpush.msra.mxu1 %v148_v19 }
  0x1b   :  { %261 = vmatpush.msra.mxu2 %v75_v10  ;;  %119 = vmatpush.msra.mxu0 %v75_v10 }
  0x1c   :  { %269 = vmatpush.msra.mxu3 %v147_v20  ;;  %190 = vmatpush.msra.mxu1 %v147_v20 }
  0x1d   :  { %262 = vmatpush.msra.mxu2 %v74_v12  ;;  %120 = vmatpush.msra.mxu0 %v74_v12 }
  0x1e   :  { %246 = vmatmul.msk.f32.vlgmr.msra.gmra.mxu2 %vm86_vm0, %v71_v13  ;;  %243 = vmatmul.msk.f32.vlgmr.msra.gmra.mxu0 %vm86_vm0, %v68_v14 }
  0x1f   :  { %270 = vmatpush.msra.mxu3 %v146_v21  ;;  %191 = vmatpush.msra.mxu1 %v146_v21 }
  0x26   :  { %247 = vmatmul.msk.f32.gmra.mxu2 %vm86_vm0, %v72_v15  ;;  %244 = vmatmul.msk.f32.gmra.mxu0 %vm86_vm0, %v69_v16 }
  0x2e   :  { %248 = vmatmul.msk.f32.gmra.mxu2 %vm86_vm0, %v73_v17  ;;  %245 = vmatmul.msk.f32.gmra.mxu0 %vm86_vm0, %v70_v18 }
  0x9b   :  { %v122_v23 = vpop.f32.mrf.mxu0 }
  0x9c   :  { %v123_v24 = vadd.f32 %v277_v22, %v122_v23 }
  0x9e   :  { %v140_v25 = vmax.f32 %v123_v24, 0.0 }
  0xa0   :  { %249 = vmatmul.msk.f32.vlgmr.msra.gmra.mxu1 %vm86_vm0, %v140_v25 }
  0xa1   :  { %v131_v26 = vpop.f32.mrf.mxu2 }
  0xa2   :  { %v132_v27 = vadd.f32 %v277_v22, %v131_v26 }
  0xa3   :  { %v125_v28 = vpop.f32.mrf.mxu0 }
  0xa4   :  { %v143_v29 = vmax.f32 %v132_v27, 0.0  ;;  %v126_v30 = vadd.f32 %v277_v22, %v125_v28 }
  0xa6   :  { %252 = vmatmul.msk.f32.vlgmr.msra.gmra.mxu3 %vm86_vm0, %v143_v29  ;;  %v141_v31 = vmax.f32 %v126_v30, 0.0 }
  0xa8   :  { %250 = vmatmul.msk.f32.gmra.mxu1 %vm86_vm0, %v141_v31 }
  0xa9   :  { %v134_v32 = vpop.f32.mrf.mxu2 }
  0xaa   :  { %v135_v33 = vadd.f32 %v277_v22, %v134_v32 }
  0xab   :  { %v128_v34 = vpop.f32.mrf.mxu0 }
  0xac   :  { %v144_v35 = vmax.f32 %v135_v33, 0.0  ;;  %v129_v36 = vadd.f32 %v277_v22, %v128_v34 }
  0xae   :  { %253 = vmatmul.msk.f32.gmra.mxu3 %vm86_vm0, %v144_v35  ;;  %v142_v37 = vmax.f32 %v129_v36, 0.0 }
  0xb0   :  { %251 = vmatmul.msk.f32.gmra.mxu1 %vm86_vm0, %v142_v37 }
  0xb1   :  { %v137_v38 = vpop.f32.mrf.mxu2 }
  0xb2   :  { %v138_v39 = vadd.f32 %v277_v22, %v137_v38 }
  0xb4   :  { %v145_v40 = vmax.f32 %v138_v39, 0.0 }
  0xb6   :  { %254 = vmatmul.msk.f32.gmra.mxu3 %vm86_vm0, %v145_v40 }
 0x11d   :  { %v193_v42 = vpop.f32.mrf.mxu1 }
 0x11e   :  { %v194_v43 = vadd.f32 %v278_v41, %v193_v42 }
 0x120   :  { %v211_v44 = vmax.f32 %v194_v43, 0.0 }
 0x122   :  { %217 = vst.msk [vmem:[#allocation8] sm:$0xff] %vm86_vm0, %v211_v44 }
 0x125   :  { %v196_v45 = vpop.f32.mrf.mxu1 }
 0x126   :  { %v197_v46 = vadd.f32 %v278_v41, %v196_v45 }
 0x128   :  { %v212_v47 = vmax.f32 %v197_v46, 0.0 }
 0x129   :  { %v202_v48 = vpop.f32.mrf.mxu3 }
 0x12a   :  { %v203_v49 = vadd.f32 %v278_v41, %v202_v48  ;;  %218 = vst.msk [vmem:[#allocation8 + $0x8] sm:$0xff] %vm86_vm0, %v212_v47 }
 0x12c   :  { %v214_v50 = vmax.f32 %v203_v49, 0.0 }
 0x12d   :  { %v199_v51 = vpop.f32.mrf.mxu1 }
 0x12e   :  { %220 = vst.msk [vmem:[#allocation8 + $0x18] sm:$0xff] %vm86_vm0, %v214_v50  ;;  %v200_v52 = vadd.f32 %v278_v41, %v199_v51 }
 0x130   :  { %v213_v53 = vmax.f32 %v200_v52, 0.0 }
 0x131   :  { %v205_v54 = vpop.f32.mrf.mxu3 }
 0x132   :  { %v206_v55 = vadd.f32 %v278_v41, %v205_v54  ;;  %219 = vst.msk [vmem:[#allocation8 + $0x10] sm:$0xff] %vm86_vm0, %v213_v53 }
 0x134   :  { %v215_v56 = vmax.f32 %v206_v55, 0.0 }
 0x136   :  { %221 = vst.msk [vmem:[#allocation8 + $0x20] sm:$0xff] %vm86_vm0, %v215_v56 }
 0x139   :  { %v208_v57 = vpop.f32.mrf.mxu3 }
 0x13a   :  { %v209_v58 = vadd.f32 %v278_v41, %v208_v57 }
 0x13c   :  { %v216_v59 = vmax.f32 %v209_v58, 0.0 }
 0x13e   :  { %222 = vst.msk [vmem:[#allocation8 + $0x28] sm:$0xff] %vm86_vm0, %v216_v59 }
 0x13f   :  { %235 = dma.vmem_to_hbm [thread:$0]  %s228_s10, 768, %s230_s13, [#allocation4], %s382_s26, %s382_s26, %s383_s27  }
 0x140   :  { %379 = dma.done.wait [#allocation4], 768  }
 0x141   :  { %380 = vsyncadd [#allocation4], 4294966528 }
 0x142   :  { %240 = vsyncpa [#allocation3], 1 }
 0x143   :  { %241 = vsyncpa [#allocation6], 1 }
 0x144   :  { %242 = vsyncpa [#allocation4], 1 }

</bundles_post_ra>
